<compile_context>
chip_gen: v7x
topology: tpu7x:2x2x1
jax: 0.10.0
libtpu: 0.0.40
codegen_flags: <defaults>
</compile_context>

<pallas_src>
import numpy as np
import jax
import jax.numpy as jnp
from jax.experimental import pallas as pl
from jax.experimental.pallas import tpu as pltpu

# Action-space constants from the reference module.
HIGH = np.array([1, 1, 1, 0.1, 0.1, 0.1, 0.1], dtype=np.float32)
LOW = np.array([-1, -1, -1, -0.1, -0.1, -0.1, -0.1], dtype=np.float32)
ACTION_MIDPOINTS = (HIGH + LOW) / 2.0   # all zeros for this action space
ACTION_RANGES = (HIGH - LOW) / 2.0      # [1, 1, 1, 0.1, 0.1, 0.1, 0.1]

LANE = 128  # vreg lane width


def _round_up(x, m):
    return ((x + m - 1) // m) * m


def _cdiv(a, b):
    return -(-a // b)


def _const_row(values, shape, dtype=jnp.float32):
    """Broadcast a small row of compile-time Python constants to `shape`.

    Built from a splat constant + 2-D iota + scalar selects (lanes beyond
    len(values) keep values[0]), which lowers cleanly in Mosaic and avoids
    both dense-constant lowering and an extra VMEM operand/DMA.
    """
    vals = [float(v) for v in np.asarray(values).ravel()]
    lane = jax.lax.broadcasted_iota(jnp.int32, shape, dimension=len(shape) - 1)
    out = jnp.full(shape, vals[0], dtype)
    for k in range(1, len(vals)):
        if vals[k] != vals[0]:
            out = jnp.where(lane == k, jnp.asarray(vals[k], dtype), out)
    return out


def actor_kernel(x_ref,
                 w0_ref, b0_ref,
                 w1_ref, b1_ref,
                 w2_ref, b2_ref,
                 wo_ref, bo_ref,
                 out_ref):
    bf16 = jnp.bfloat16
    # Hidden layer 0: Linear + ReLU (bf16 matmul, f32 accumulate/epilogue).
    h = jnp.dot(x_ref[...].astype(bf16), w0_ref[...],
                preferred_element_type=jnp.float32) + b0_ref[...]
    h = jnp.maximum(h, 0.0)
    # Hidden layer 1: Linear + ReLU
    h = jnp.dot(h.astype(bf16), w1_ref[...],
                preferred_element_type=jnp.float32) + b1_ref[...]
    h = jnp.maximum(h, 0.0)
    # Hidden layer 2: Linear + ReLU
    h = jnp.dot(h.astype(bf16), w2_ref[...],
                preferred_element_type=jnp.float32) + b2_ref[...]
    h = jnp.maximum(h, 0.0)
    # Output layer (lane-padded to 128): Linear + tanh, then affine action
    # scaling with compile-time constants.  Padded lanes stay exactly 0.
    y = jnp.tanh(jnp.dot(h.astype(bf16), wo_ref[...],
                         preferred_element_type=jnp.float32) + bo_ref[...])
    act = y * _const_row(ACTION_RANGES, y.shape)
    if np.any(ACTION_MIDPOINTS != 0.0):   # compile-time fold: midpoints are zero
        act = act + _const_row(ACTION_MIDPOINTS, y.shape)
    out_ref[...] = act


def actor_forward(x, params, *, block_batch=1024):
    """Run the fused Actor MLP. x: (B, state_plus_goal_size) f32."""
    (w0, b0), (w1, b1), (w2, b2), (wo, bo) = params
    batch, in_dim = x.shape
    h0, h1, h2 = w0.shape[1], w1.shape[1], w2.shape[1]
    action_size = wo.shape[1]

    # Lane-dense output layer: pad the 7-wide output to a full 128-lane vreg.
    out_pad = _round_up(max(action_size, LANE), LANE)
    wo_p = jnp.pad(wo, ((0, 0), (0, out_pad - action_size)))
    bo_p = jnp.pad(bo, ((0, 0), (0, out_pad - action_size)))

    # bf16 weights for the MXU (cast once, here); biases stay f32.
    w0b = w0.astype(jnp.bfloat16)
    w1b = w1.astype(jnp.bfloat16)
    w2b = w2.astype(jnp.bfloat16)
    wob = wo_p.astype(jnp.bfloat16)

    # Batch tiling:
    #  * tiny batches: pad to one full 8-row sublane group, single tile
    #  * batch >= 16: cap tile at cdiv(batch, 2) (rounded to 8) so the grid
    #    has >= 2 "parallel" steps (both v7x TensorCores busy); block_batch
    #    bounds the tile for very large batches (fewer steps on v5e/v6e).
    if batch >= 16:
        tm = int(min(block_batch, _round_up(_cdiv(batch, 2), 8)))
    else:
        tm = int(_round_up(max(batch, 8), 8))
    num_blocks = _cdiv(batch, tm)
    padded = num_blocks * tm
    if padded != batch:
        x = jnp.pad(x, ((0, padded - batch), (0, 0)))

    # Weights/biases: constant index_map -> stay VMEM resident across tiles.
    def w_spec(arr):
        return pl.BlockSpec(arr.shape, lambda i: (0, 0))

    flops = 2 * padded * (in_dim * h0 + h0 * h1 + h1 * h2 + h2 * out_pad)
    param_bytes = (2 * sum(int(np.prod(a.shape)) for a in (w0b, w1b, w2b, wob))
                   + 4 * sum(int(np.prod(a.shape)) for a in (b0, b1, b2, bo_p)))
    bytes_accessed = 4 * padded * (in_dim + out_pad) + param_bytes

    out = pl.pallas_call(
        actor_kernel,
        out_shape=jax.ShapeDtypeStruct((padded, out_pad), jnp.float32),
        grid=(num_blocks,),
        in_specs=[
            pl.BlockSpec((tm, in_dim), lambda i: (i, 0)),
            w_spec(w0b), w_spec(b0),
            w_spec(w1b), w_spec(b1),
            w_spec(w2b), w_spec(b2),
            w_spec(wob), w_spec(bo_p),
        ],
        out_specs=pl.BlockSpec((tm, out_pad), lambda i: (i, 0)),
        compiler_params=pltpu.CompilerParams(
            dimension_semantics=("parallel",)),
        cost_estimate=pl.CostEstimate(
            flops=int(flops),
            transcendentals=int(padded * out_pad),
            bytes_accessed=int(bytes_accessed)),
    )(x, w0b, b0, w1b, b1, w2b, b2, wob, bo_p)
    return out[:batch, :action_size]


def init_linear(key, fan_in, fan_out):
    """Deterministic PyTorch-style uniform(-1/sqrt(fan_in), 1/sqrt(fan_in)) init.

    Weight is returned as (fan_in, fan_out); bias as (1, fan_out) for broadcast.
    """
    kw, kb = jax.random.split(key)
    bound = 1.0 / np.sqrt(fan_in)
    w = jax.random.uniform(kw, (fan_in, fan_out), jnp.float32, -bound, bound)
    b = jax.random.uniform(kb, (1, fan_out), jnp.float32, -bound, bound)
    return w, b


def make_params(key, state_plus_goal_size, action_size, hidden_sizes=(256, 256, 256)):
    keys = jax.random.split(key, len(hidden_sizes) + 1)
    sizes = [state_plus_goal_size] + list(hidden_sizes) + [action_size]
    params = []
    for i in range(len(sizes) - 1):
        params.append(init_linear(keys[i], sizes[i], sizes[i + 1]))
    return params


def actor_reference(x, params):
    """Pure-JAX f32 reference for correctness checking."""
    (w0, b0), (w1, b1), (w2, b2), (wo, bo) = params
    h = jnp.maximum(x @ w0 + b0, 0.0)
    h = jnp.maximum(h @ w1 + b1, 0.0)
    h = jnp.maximum(h @ w2 + b2, 0.0)
    y = jnp.tanh(h @ wo + bo)
    return y * ACTION_RANGES[None, :] + ACTION_MIDPOINTS[None, :]


if __name__ == "__main__":
    key = jax.random.PRNGKey(0)
    k_params, k_x_small, k_x_big = jax.random.split(key, 3)

    state_plus_goal_size = 32
    action_size = 7  # implied by `high`/`low` arrays in the reference module
    params = make_params(k_params, state_plus_goal_size, action_size)

    # Tolerance is loosened vs the f32 reference because the kernel runs
    # bf16 matmuls (f32 accumulation) on the MXU.
    RTOL, ATOL = 2e-2, 2e-2

    # Small inference-style batch (padded to one 8-row sublane group).
    x_small = jax.random.normal(k_x_small, (2, state_plus_goal_size), jnp.float32)
    out_small = jax.block_until_ready(actor_forward(x_small, params))
    np.testing.assert_allclose(np.asarray(out_small),
                               np.asarray(actor_reference(x_small, params)),
                               rtol=RTOL, atol=ATOL)

    # Larger batch exercises the batch-tiled grid (resident weights, 2 tiles).
    x_big = jax.random.normal(k_x_big, (1024, state_plus_goal_size), jnp.float32)
    out_big = jax.block_until_ready(actor_forward(x_big, params))
    np.testing.assert_allclose(np.asarray(out_big),
                               np.asarray(actor_reference(x_big, params)),
                               rtol=RTOL, atol=ATOL)

    print("KERNEL_OK")
</pallas_src>

<mosaic_0001>
module attributes {stable_mosaic.version = 11 : i64} {
  func.func @actor_kernel(%arg0: i32, %arg1: memref<8x32xf32, #tpu.memory_space<vmem>>, %arg2: memref<32x256xbf16, #tpu.memory_space<vmem>>, %arg3: memref<1x256xf32, #tpu.memory_space<vmem>>, %arg4: memref<256x256xbf16, #tpu.memory_space<vmem>>, %arg5: memref<1x256xf32, #tpu.memory_space<vmem>>, %arg6: memref<256x256xbf16, #tpu.memory_space<vmem>>, %arg7: memref<1x256xf32, #tpu.memory_space<vmem>>, %arg8: memref<256x128xbf16, #tpu.memory_space<vmem>>, %arg9: memref<1x128xf32, #tpu.memory_space<vmem>>, %arg10: memref<8x128xf32, #tpu.memory_space<vmem>>) attributes {dimension_semantics = [#tpu.dimension_semantics<parallel>], iteration_bounds = array<i64: 1>, scalar_prefetch = 0 : i64, scratch_operands = 0 : i64, tpu.core_type = #tpu.core_type<tc>, window_params = [{transform_indices = @transform_0, window_bounds = array<i64: 8, 32>}, {pipeline_mode = #tpu.pipeline_mode<synchronous>, transform_indices = @transform_1, window_bounds = array<i64: 32, 256>}, {pipeline_mode = #tpu.pipeline_mode<synchronous>, transform_indices = @transform_2, window_bounds = array<i64: 1, 256>}, {pipeline_mode = #tpu.pipeline_mode<synchronous>, transform_indices = @transform_3, window_bounds = array<i64: 256, 256>}, {pipeline_mode = #tpu.pipeline_mode<synchronous>, transform_indices = @transform_4, window_bounds = array<i64: 1, 256>}, {pipeline_mode = #tpu.pipeline_mode<synchronous>, transform_indices = @transform_5, window_bounds = array<i64: 256, 256>}, {pipeline_mode = #tpu.pipeline_mode<synchronous>, transform_indices = @transform_6, window_bounds = array<i64: 1, 256>}, {pipeline_mode = #tpu.pipeline_mode<synchronous>, transform_indices = @transform_7, window_bounds = array<i64: 256, 128>}, {pipeline_mode = #tpu.pipeline_mode<synchronous>, transform_indices = @transform_8, window_bounds = array<i64: 1, 128>}, {transform_indices = @transform_9, window_bounds = array<i64: 8, 128>}]} {
    %c0 = arith.constant 0 : index
    %c0_0 = arith.constant 0 : index
    %0 = vector.load %arg1[%c0, %c0_0] : memref<8x32xf32, #tpu.memory_space<vmem>>, vector<8x32xf32>
    %1 = arith.truncf %0 : vector<8x32xf32> to vector<8x32xbf16>
    %c0_1 = arith.constant 0 : index
    %c0_2 = arith.constant 0 : index
    %2 = vector.load %arg2[%c0_1, %c0_2] : memref<32x256xbf16, #tpu.memory_space<vmem>>, vector<32x256xbf16>
    %cst = arith.constant dense<0.000000e+00> : vector<8x256xf32>
    %3 = tpu.matmul %1, %2, %cst {dimension_numbers = #tpu.dot_dimension_numbers<[1], [0], [0], [1], [0, 0, 1, 1], [], []>} : vector<8x32xbf16>, vector<32x256xbf16>, vector<8x256xf32> -> vector<8x256xf32>
    %c0_3 = arith.constant 0 : index
    %c0_4 = arith.constant 0 : index
    %4 = vector.load %arg3[%c0_3, %c0_4] : memref<1x256xf32, #tpu.memory_space<vmem>>, vector<1x256xf32>
    %5 = vector.broadcast %4 : vector<1x256xf32> to vector<8x256xf32>
    %6 = arith.addf %3, %5 : vector<8x256xf32>
    %cst_5 = arith.constant 0.000000e+00 : f32
    %7 = vector.broadcast %cst_5 : f32 to vector<8x256xf32>
    %8 = arith.maximumf %6, %7 : vector<8x256xf32>
    %9 = arith.truncf %8 : vector<8x256xf32> to vector<8x256xbf16>
    %c0_6 = arith.constant 0 : index
    %c0_7 = arith.constant 0 : index
    %10 = vector.load %arg4[%c0_6, %c0_7] : memref<256x256xbf16, #tpu.memory_space<vmem>>, vector<256x256xbf16>
    %cst_8 = arith.constant dense<0.000000e+00> : vector<8x256xf32>
    %11 = tpu.matmul %9, %10, %cst_8 {dimension_numbers = #tpu.dot_dimension_numbers<[1], [0], [0], [1], [0, 0, 1, 1], [], []>} : vector<8x256xbf16>, vector<256x256xbf16>, vector<8x256xf32> -> vector<8x256xf32>
    %c0_9 = arith.constant 0 : index
    %c0_10 = arith.constant 0 : index
    %12 = vector.load %arg5[%c0_9, %c0_10] : memref<1x256xf32, #tpu.memory_space<vmem>>, vector<1x256xf32>
    %13 = vector.broadcast %12 : vector<1x256xf32> to vector<8x256xf32>
    %14 = arith.addf %11, %13 : vector<8x256xf32>
    %cst_11 = arith.constant 0.000000e+00 : f32
    %15 = vector.broadcast %cst_11 : f32 to vector<8x256xf32>
    %16 = arith.maximumf %14, %15 : vector<8x256xf32>
    %17 = arith.truncf %16 : vector<8x256xf32> to vector<8x256xbf16>
    %c0_12 = arith.constant 0 : index
    %c0_13 = arith.constant 0 : index
    %18 = vector.load %arg6[%c0_12, %c0_13] : memref<256x256xbf16, #tpu.memory_space<vmem>>, vector<256x256xbf16>
    %cst_14 = arith.constant dense<0.000000e+00> : vector<8x256xf32>
    %19 = tpu.matmul %17, %18, %cst_14 {dimension_numbers = #tpu.dot_dimension_numbers<[1], [0], [0], [1], [0, 0, 1, 1], [], []>} : vector<8x256xbf16>, vector<256x256xbf16>, vector<8x256xf32> -> vector<8x256xf32>
    %c0_15 = arith.constant 0 : index
    %c0_16 = arith.constant 0 : index
    %20 = vector.load %arg7[%c0_15, %c0_16] : memref<1x256xf32, #tpu.memory_space<vmem>>, vector<1x256xf32>
    %21 = vector.broadcast %20 : vector<1x256xf32> to vector<8x256xf32>
    %22 = arith.addf %19, %21 : vector<8x256xf32>
    %cst_17 = arith.constant 0.000000e+00 : f32
    %23 = vector.broadcast %cst_17 : f32 to vector<8x256xf32>
    %24 = arith.maximumf %22, %23 : vector<8x256xf32>
    %25 = arith.truncf %24 : vector<8x256xf32> to vector<8x256xbf16>
    %c0_18 = arith.constant 0 : index
    %c0_19 = arith.constant 0 : index
    %26 = vector.load %arg8[%c0_18, %c0_19] : memref<256x128xbf16, #tpu.memory_space<vmem>>, vector<256x128xbf16>
    %cst_20 = arith.constant dense<0.000000e+00> : vector<8x128xf32>
    %27 = tpu.matmul %25, %26, %cst_20 {dimension_numbers = #tpu.dot_dimension_numbers<[1], [0], [0], [1], [0, 0, 1, 1], [], []>} : vector<8x256xbf16>, vector<256x128xbf16>, vector<8x128xf32> -> vector<8x128xf32>
    %c0_21 = arith.constant 0 : index
    %c0_22 = arith.constant 0 : index
    %28 = vector.load %arg9[%c0_21, %c0_22] : memref<1x128xf32, #tpu.memory_space<vmem>>, vector<1x128xf32>
    %29 = vector.broadcast %28 : vector<1x128xf32> to vector<8x128xf32>
    %30 = arith.addf %27, %29 : vector<8x128xf32>
    %31 = math.tanh %30 : vector<8x128xf32>
    %32 = tpu.iota {dimensions = array<i32: 1>} : vector<8x128xi32>
    %cst_23 = arith.constant 1.000000e+00 : f32
    %33 = vector.broadcast %cst_23 : f32 to vector<8x128xf32>
    %c3_i32 = arith.constant 3 : i32
    %34 = vector.broadcast %c3_i32 : i32 to vector<8x128xi32>
    %35 = arith.cmpi eq, %32, %34 : vector<8x128xi32>
    %cst_24 = arith.constant 1.000000e-01 : f32
    %36 = vector.broadcast %cst_24 : f32 to vector<8x128xf32>
    %37 = arith.select %35, %36, %33 : vector<8x128xi1>, vector<8x128xf32>
    %c4_i32 = arith.constant 4 : i32
    %38 = vector.broadcast %c4_i32 : i32 to vector<8x128xi32>
    %39 = arith.cmpi eq, %32, %38 : vector<8x128xi32>
    %cst_25 = arith.constant 1.000000e-01 : f32
    %40 = vector.broadcast %cst_25 : f32 to vector<8x128xf32>
    %41 = arith.select %39, %40, %37 : vector<8x128xi1>, vector<8x128xf32>
    %c5_i32 = arith.constant 5 : i32
    %42 = vector.broadcast %c5_i32 : i32 to vector<8x128xi32>
    %43 = arith.cmpi eq, %32, %42 : vector<8x128xi32>
    %cst_26 = arith.constant 1.000000e-01 : f32
    %44 = vector.broadcast %cst_26 : f32 to vector<8x128xf32>
    %45 = arith.select %43, %44, %41 : vector<8x128xi1>, vector<8x128xf32>
    %c6_i32 = arith.constant 6 : i32
    %46 = vector.broadcast %c6_i32 : i32 to vector<8x128xi32>
    %47 = arith.cmpi eq, %32, %46 : vector<8x128xi32>
    %cst_27 = arith.constant 1.000000e-01 : f32
    %48 = vector.broadcast %cst_27 : f32 to vector<8x128xf32>
    %49 = arith.select %47, %48, %45 : vector<8x128xi1>, vector<8x128xf32>
    %50 = arith.mulf %31, %49 : vector<8x128xf32>
    %c0_28 = arith.constant 0 : index
    %c0_29 = arith.constant 0 : index
    %51 = vector.load %arg10[%c0_28, %c0_29] : memref<8x128xf32, #tpu.memory_space<vmem>>, vector<8x128xf32>
    tpu.vector_store %arg10[%c0_28, %c0_29], %50 {strides = array<i32>} : memref<8x128xf32, #tpu.memory_space<vmem>>, vector<8x128xf32>,
    return
  }
  func.func @transform_0(%arg0: i32) -> (i32, i32) {
    %c0_i32 = arith.constant 0 : i32
    %c0_i32_0 = arith.constant 0 : i32
    return %arg0, %c0_i32 : i32, i32
  }
  func.func @transform_1(%arg0: i32) -> (i32, i32) {
    %c0_i32 = arith.constant 0 : i32
    %c0_i32_0 = arith.constant 0 : i32
    %c0_i32_1 = arith.constant 0 : i32
    return %c0_i32, %c0_i32_0 : i32, i32
  }
  func.func @transform_2(%arg0: i32) -> (i32, i32) {
    %c0_i32 = arith.constant 0 : i32
    %c0_i32_0 = arith.constant 0 : i32
    %c0_i32_1 = arith.constant 0 : i32
    return %c0_i32, %c0_i32_0 : i32, i32
  }
  func.func @transform_3(%arg0: i32) -> (i32, i32) {
    %c0_i32 = arith.constant 0 : i32
    %c0_i32_0 = arith.constant 0 : i32
    %c0_i32_1 = arith.constant 0 : i32
    return %c0_i32, %c0_i32_0 : i32, i32
  }
  func.func @transform_4(%arg0: i32) -> (i32, i32) {
    %c0_i32 = arith.constant 0 : i32
    %c0_i32_0 = arith.constant 0 : i32
    %c0_i32_1 = arith.constant 0 : i32
    return %c0_i32, %c0_i32_0 : i32, i32
  }
  func.func @transform_5(%arg0: i32) -> (i32, i32) {
    %c0_i32 = arith.constant 0 : i32
    %c0_i32_0 = arith.constant 0 : i32
    %c0_i32_1 = arith.constant 0 : i32
    return %c0_i32, %c0_i32_0 : i32, i32
  }
  func.func @transform_6(%arg0: i32) -> (i32, i32) {
    %c0_i32 = arith.constant 0 : i32
    %c0_i32_0 = arith.constant 0 : i32
    %c0_i32_1 = arith.constant 0 : i32
    return %c0_i32, %c0_i32_0 : i32, i32
  }
  func.func @transform_7(%arg0: i32) -> (i32, i32) {
    %c0_i32 = arith.constant 0 : i32
    %c0_i32_0 = arith.constant 0 : i32
    %c0_i32_1 = arith.constant 0 : i32
    return %c0_i32, %c0_i32_0 : i32, i32
  }
  func.func @transform_8(%arg0: i32) -> (i32, i32) {
    %c0_i32 = arith.constant 0 : i32
    %c0_i32_0 = arith.constant 0 : i32
    %c0_i32_1 = arith.constant 0 : i32
    return %c0_i32, %c0_i32_0 : i32, i32
  }
  func.func @transform_9(%arg0: i32) -> (i32, i32) {
    %c0_i32 = arith.constant 0 : i32
    %c0_i32_0 = arith.constant 0 : i32
    return %arg0, %c0_i32 : i32, i32
  }
}

</mosaic_0001>

<bundles_post_ra>
// kernel: tpu_custom_call.1
= control target key start
LH: loop header
LB: loop body
LE: loop exit
PB: predicated region body
PF: predicated region fallthrough
CT: control target
= control target key end

     0   :  { %14 = vsyncpa [#allocation3], 0  ;;  %s1437_s0 = inlined_call_operand.hbm [shape: f32[8,32], index: 0, kind: input, shape index: {}]   ;;  %s1438_s1 = inlined_call_operand.hbm [shape: bf16[32,256], index: 1, kind: input, shape index: {}]   ;;  %s1439_s2 = inlined_call_operand.vmem [shape: f32[1,256], index: 2, kind: input, shape index: {}]   ;;  %s1440_s3 = inlined_call_operand.hbm [shape: bf16[256,256], index: 3, kind: input, shape index: {}]   ;;  %s1441_s4 = inlined_call_operand.vmem [shape: f32[1,256], index: 4, kind: input, shape index: {}]   ;;  %s1442_s5 = inlined_call_operand.hbm [shape: bf16[256,256], index: 5, kind: input, shape index: {}]   ;;  %s1443_s6 = inlined_call_operand.vmem [shape: f32[1,256], index: 6, kind: input, shape index: {}]   ;;  %s1444_s7 = inlined_call_operand.hbm [shape: bf16[256,128], index: 7, kind: input, shape index: {}]   ;;  %s1445_s8 = inlined_call_operand.vmem [shape: f32[1,128], index: 8, kind: input, shape index: {}]   ;;  %s1446_s9 = inlined_call_operand.hbm [shape: f32[8,128], index: 9, kind: output, shape index: {}]  }
   0x1   :  { %15 = vsyncpa [#allocation6], 0 }
   0x2   :  { %16 = vsyncpa [#allocation9], 0 }
   0x3   :  { %17 = vsyncpa [#allocation4], 0  ;;  %s1270_s30 = smov [#allocation5]   ;;  %s1130_s13 = scalar_lea.hbm %s1438_s1, 512 }
   0x4   :  { %s33_s10 = sshll.u32 %s1270_s30, 4  ;;  %p1131_p0 = scmp.ne.s32.totalorder %s1438_s1, %s1130_s13  ;;  %s34_s10 = int_to_ptr.vmem [resolvable:$true] %s33_s10 }
   0x5   :  { %p1134_p1 = scmp.lt.u32.totalorder %s1130_s13, %s1438_s1 }
   0x7   :  { %p1136_p2 = pnand %p1134_p1, %p1131_p0 }
   0x9   :  { %1139 = shalt.err (!%p1136_p2)
}
   0xa   :  { %s1140_s18 = scalar_lea.vmem %s34_s10, 512  ;;  %p1145_p4 = scmp.lt.s32.totalorder %s34_s10, %s34_s10 }
   0xb   :  { %p1141_p3 = scmp.ne.s32.totalorder %s34_s10, %s1140_s18  ;;  %p1146_p5 = scmp.lt.s32.totalorder %s1140_s18, %s1140_s18 }
   0xd   :  { %p1147_p6 = por %p1146_p5, %p1145_p4 }
   0xf   :  { %p1148_p7 = pnand %p1147_p6, %p1141_p3 }
  0x11   :  { %1151 = shalt.err (!%p1148_p7)
}
  0x12   :  { %s1271_s19 = smov 128   ;;  %s1272_s20 = smov 8  }
  0x13   :  { %39 = dma.hbm_to_vmem [thread:$0]  %s1438_s1, 512, %s34_s10, [#allocation6], %s1271_s19, %s1271_s19, %s1272_s20  }
  0x14   :  { %s1273_s23 = smov [#allocation8]   ;;  %s1274_s25 = smov [#allocation2]  }
  0x15   :  { %s61_s24 = sshll.u32 %s1273_s23, 4  ;;  %s24_s26 = sshll.u32 %s1274_s25, 4  ;;  %s62_s24 = int_to_ptr.vmem [resolvable:$true] %s61_s24  ;;  %s25_s26 = int_to_ptr.vmem [resolvable:$true] %s24_s26 }
  0x16   :  { %s1152_s29 = scalar_lea.hbm %s1442_s5, 4096 }
  0x17   :  { %p1153_p8 = scmp.ne.s32.totalorder %s1442_s5, %s1152_s29  ;;  %p1156_p9 = scmp.lt.u32.totalorder %s1152_s29, %s1442_s5 }
  0x19   :  { %p1158_p10 = pnand %p1156_p9, %p1153_p8 }
  0x1b   :  { %1161 = shalt.err (!%p1158_p10)
}
  0x1c   :  { %s1162_s1 = scalar_lea.vmem %s62_s24, 4096  ;;  %p1167_p12 = scmp.lt.s32.totalorder %s62_s24, %s62_s24 }
  0x1d   :  { %p1163_p11 = scmp.ne.s32.totalorder %s62_s24, %s1162_s1  ;;  %p1168_p13 = scmp.lt.s32.totalorder %s1162_s1, %s1162_s1 }
  0x1f   :  { %p1169_p0 = por %p1168_p13, %p1167_p12 }
  0x21   :  { %p1170_p1 = pnand %p1169_p0, %p1163_p11 }
  0x23   :  { %1173 = shalt.err (!%p1170_p1)
}
  0x24   :  { %67 = dma.hbm_to_vmem [thread:$0]  %s1442_s5, 4096, %s62_s24, [#allocation9], %s1271_s19, %s1271_s19, %s1272_s20  }
  0x25   :  { %s1174_s17 = scalar_lea.hbm %s1437_s0, 128 }
  0x26   :  { %p1175_p2 = scmp.ne.s32.totalorder %s1437_s0, %s1174_s17  ;;  %p1178_p3 = scmp.lt.u32.totalorder %s1174_s17, %s1437_s0 }
  0x28   :  { %p1180_p4 = pnand %p1178_p3, %p1175_p2 }
  0x2a   :  { %1183 = shalt.err (!%p1180_p4)
}
  0x2b   :  { %s1184_s25 = scalar_lea.vmem %s25_s26, 128  ;;  %p1189_p6 = scmp.lt.s32.totalorder %s25_s26, %s25_s26 }
  0x2c   :  { %p1185_p5 = scmp.ne.s32.totalorder %s25_s26, %s1184_s25  ;;  %p1190_p7 = scmp.lt.s32.totalorder %s1184_s25, %s1184_s25 }
  0x2e   :  { %p1191_p8 = por %p1190_p7, %p1189_p6 }
  0x30   :  { %p1192_p9 = pnand %p1191_p8, %p1185_p5 }
  0x32   :  { %1195 = shalt.err (!%p1192_p9)
}
  0x33   :  { %27 = dma.hbm_to_vmem [thread:$0]  %s1437_s0, 128, %s25_s26, [#allocation3]  }
  0x34   :  { %s1275_s27 = smov [#allocation7]   ;;  %s1276_s29 = smov [#allocation10]  }
  0x35   :  { %s47_s28 = sshll.u32 %s1275_s27, 4  ;;  %s75_s30 = sshll.u32 %s1276_s29, 4  ;;  %s48_s28 = int_to_ptr.vmem [resolvable:$true] %s47_s28  ;;  %s76_s30 = int_to_ptr.vmem [resolvable:$true] %s75_s30 }
  0x36   :  { %s1196_s13 = scalar_lea.hbm %s1440_s3, 4096 }
  0x37   :  { %p1197_p10 = scmp.ne.s32.totalorder %s1440_s3, %s1196_s13  ;;  %p1200_p11 = scmp.lt.u32.totalorder %s1196_s13, %s1440_s3 }
  0x39   :  { %p1202_p12 = pnand %p1200_p11, %p1197_p10 }
  0x3b   :  { %1205 = shalt.err (!%p1202_p12)
}
  0x3c   :  { %s1206_s0 = scalar_lea.vmem %s48_s28, 4096  ;;  %p1211_p0 = scmp.lt.s32.totalorder %s48_s28, %s48_s28 }
  0x3d   :  { %p1207_p13 = scmp.ne.s32.totalorder %s48_s28, %s1206_s0  ;;  %p1212_p1 = scmp.lt.s32.totalorder %s1206_s0, %s1206_s0 }
  0x3f   :  { %p1213_p2 = por %p1212_p1, %p1211_p0 }
  0x41   :  { %p1214_p3 = pnand %p1213_p2, %p1207_p13 }
  0x43   :  { %1217 = shalt.err (!%p1214_p3)
}
  0x44   :  { %53 = dma.hbm_to_vmem [thread:$0]  %s1440_s3, 4096, %s48_s28, [#allocation6], %s1271_s19, %s1271_s19, %s1272_s20  }
  0x45   :  { %s1218_s21 = scalar_lea.hbm %s1444_s7, 2048 }
  0x46   :  { %p1219_p4 = scmp.ne.s32.totalorder %s1444_s7, %s1218_s21  ;;  %p1222_p5 = scmp.lt.u32.totalorder %s1218_s21, %s1444_s7 }
  0x48   :  { %p1224_p6 = pnand %p1222_p5, %p1219_p4 }
  0x4a   :  { %1227 = shalt.err (!%p1224_p6)
}
  0x4b   :  { %s1228_s24 = scalar_lea.vmem %s76_s30, 2048  ;;  %p1233_p8 = scmp.lt.s32.totalorder %s76_s30, %s76_s30 }
  0x4c   :  { %p1229_p7 = scmp.ne.s32.totalorder %s76_s30, %s1228_s24  ;;  %p1234_p9 = scmp.lt.s32.totalorder %s1228_s24, %s1228_s24 }
  0x4e   :  { %p1235_p10 = por %p1234_p9, %p1233_p8 }
  0x50   :  { %p1236_p11 = pnand %p1235_p10, %p1229_p7 }
  0x52   :  { %1239 = shalt.err (!%p1236_p11)
}
  0x53   :  { %s1277_s3 = smov 64   ;;  %s1278_s19 = smov 4  }
  0x54   :  { %81 = dma.hbm_to_vmem [thread:$0]  %s1444_s7, 2048, %s76_s30, [#allocation9], %s1277_s3, %s1277_s3, %s1278_s19  }
  0x55   :  { %1262 = dma.done.wait [#allocation3], 128  }
  0x56   :  { %1263 = vsyncadd [#allocation3], 4294967168 }
  0x57   :  { %1264 = dma.done.wait [#allocation6], 4608  }
  0x58   :  { %1265 = vsyncadd [#allocation6], 4294962688 }
  0x59   :  { %1266 = dma.done.wait [#allocation9], 6144  }
  0x5a   :  { %1267 = vsyncadd [#allocation9], 4294961152  ;;  %v1279_v0 = vmov 0   ;;  %v1010_v1 = vld [vmem:[#allocation5 + $0x4] ss:$8 sps:$4 sm:$0xff]   ;;  %v100_v5 = vld [vmem:[#allocation2] sm:$0xff] }
  0x5b   :  { %174 = vmatprep.mubr.bf16.mxu0 %v1279_v0  ;;  %v1012_v2 = vld [vmem:[#allocation5] ss:$8 sps:$4 sm:$0xff]   ;;  %142 = vmatprep.subr.bf16.mxu0 %v1010_v1  ;;  %v1013_v3 = vld [vmem:[#allocation5 + $0x14] ss:$8 sps:$4 sm:$0xff]   ;;  %v1015_v4 = vld [vmem:[#allocation5 + $0x10] ss:$8 sps:$4 sm:$0xff]   ;;  %v101_v9 = vpack.c.bf16 %v100_v5, %v100_v5 }
  0x5c   :  { %143 = vmatpush1.bf16.msra.mxu0 %v1012_v2  ;;  %v1016_v6 = vld [vmem:[#allocation7 + $0x4] ss:$8 sps:$4 sm:$0xff]   ;;  %v1018_v7 = vld [vmem:[#allocation7] ss:$8 sps:$4 sm:$0xff]   ;;  %v1019_v8 = vld [vmem:[#allocation7 + $0x14] ss:$8 sps:$4 sm:$0xff]  }
  0x5d   :  { %144 = vmatprep.subr.bf16.mxu0 %v1013_v3  ;;  %391 = vmatprep.subr.bf16.mxu1 %v1016_v6  ;;  %v1021_v10 = vld [vmem:[#allocation7 + $0x10] ss:$8 sps:$4 sm:$0xff]   ;;  %vm138_vm0 = vcmask 261120   ;;  %v1022_v11 = vld [vmem:[#allocation7 + $0x24] ss:$8 sps:$4 sm:$0xff]   ;;  %v108_v3 = vlaneseq  ;;  %s1281_s12 = smov [#allocation11]  }
  0x5e   :  { %392 = vmatpush1.bf16.msra.mxu1 %v1018_v7  ;;  %v1024_v12 = vld [vmem:[#allocation7 + $0x20] ss:$8 sps:$4 sm:$0xff]   ;;  %v1025_v13 = vld [vmem:[#allocation7 + $0x34] ss:$8 sps:$4 sm:$0xff]   ;;  %v1027_v14 = vld [vmem:[#allocation7 + $0x30] ss:$8 sps:$4 sm:$0xff]  }
  0x5f   :  { %393 = vmatprep.subr.bf16.mxu1 %v1019_v8  ;;  %v1028_v15 = vld [vmem:[#allocation7 + $0x44] ss:$8 sps:$4 sm:$0xff]   ;;  %v1030_v16 = vld [vmem:[#allocation7 + $0x40] ss:$8 sps:$4 sm:$0xff]   ;;  %v1031_v17 = vld [vmem:[#allocation7 + $0x54] ss:$8 sps:$4 sm:$0xff]  }
  0x60   :  { %145 = vmatpush1.bf16.msra.mxu0 %v1015_v4  ;;  %v1033_v18 = vld [vmem:[#allocation7 + $0x50] ss:$8 sps:$4 sm:$0xff]   ;;  %v1034_v19 = vld [vmem:[#allocation7 + $0x64] ss:$8 sps:$4 sm:$0xff]   ;;  %v1036_v20 = vld [vmem:[#allocation7 + $0x60] ss:$8 sps:$4 sm:$0xff]  }
  0x61   :  { %v1037_v21 = vld [vmem:[#allocation7 + $0x74] ss:$8 sps:$4 sm:$0xff]   ;;  %v1039_v22 = vld [vmem:[#allocation7 + $0x70] ss:$8 sps:$4 sm:$0xff]   ;;  %v1040_v23 = vld [vmem:[#allocation7 + $0x84] ss:$8 sps:$4 sm:$0xff]  }
  0x62   :  { %394 = vmatpush1.bf16.msra.mxu1 %v1021_v10  ;;  %v1042_v24 = vld [vmem:[#allocation7 + $0x80] ss:$8 sps:$4 sm:$0xff]   ;;  %v1043_v25 = vld [vmem:[#allocation7 + $0x94] ss:$8 sps:$4 sm:$0xff]   ;;  %v1045_v26 = vld [vmem:[#allocation7 + $0x90] ss:$8 sps:$4 sm:$0xff]  }
  0x63   :  { %894 = vmatmul.mubr.msk.bf16.vlgmr.msra.gmra.mrb[0].mxu0 %vm138_vm0, %v101_v9  ;;  %395 = vmatprep.subr.bf16.mxu1 %v1022_v11  ;;  %v1046_v27 = vld [vmem:[#allocation7 + $0xa4] ss:$8 sps:$4 sm:$0xff]   ;;  %v1048_v28 = vld [vmem:[#allocation7 + $0xa0] ss:$8 sps:$4 sm:$0xff]   ;;  %v1049_v29 = vld [vmem:[#allocation7 + $0xb4] ss:$8 sps:$4 sm:$0xff]  }
  0x64   :  { %v1051_v30 = vld [vmem:[#allocation7 + $0xb0] ss:$8 sps:$4 sm:$0xff]   ;;  %v1052_v31 = vld [vmem:[#allocation7 + $0xc4] ss:$8 sps:$4 sm:$0xff]   ;;  %v1054_v32 = vld [vmem:[#allocation7 + $0xc0] ss:$8 sps:$4 sm:$0xff]  }
  0x65   :  { %v1055_v33 = vld [vmem:[#allocation7 + $0xd4] ss:$8 sps:$4 sm:$0xff]   ;;  %v1057_v34 = vld [vmem:[#allocation7 + $0xd0] ss:$8 sps:$4 sm:$0xff]   ;;  %v1058_v35 = vld [vmem:[#allocation7 + $0xe4] ss:$8 sps:$4 sm:$0xff]  }
  0x66   :  { %396 = vmatpush1.bf16.msra.mxu1 %v1024_v12  ;;  %v1060_v36 = vld [vmem:[#allocation7 + $0xe0] ss:$8 sps:$4 sm:$0xff]   ;;  %v1061_v37 = vld [vmem:[#allocation7 + $0xf4] ss:$8 sps:$4 sm:$0xff]   ;;  %v1063_v38 = vld [vmem:[#allocation7 + $0xf0] ss:$8 sps:$4 sm:$0xff]  }
  0x67   :  { %397 = vmatprep.subr.bf16.mxu1 %v1025_v13  ;;  %v1064_v39 = vld [vmem:[#allocation8] ss:$8 sps:$4 sm:$0xff]   ;;  %v1066_v40 = vld [vmem:[#allocation8 + $0x4] ss:$8 sps:$4 sm:$0xff]   ;;  %v1069_v41 = vld [vmem:[#allocation8 + $0x14] ss:$8 sps:$4 sm:$0xff]  }
  0x68   :  { %640 = vmatprep.subr.bf16.mxu0 %v1066_v40  ;;  %v1067_v42 = vld [vmem:[#allocation8 + $0x10] ss:$8 sps:$4 sm:$0xff]   ;;  %v1072_v43 = vld [vmem:[#allocation8 + $0x24] ss:$8 sps:$4 sm:$0xff]   ;;  %v1070_v44 = vld [vmem:[#allocation8 + $0x20] ss:$8 sps:$4 sm:$0xff]  }
  0x69   :  { %641 = vmatpush1.bf16.msra.mxu0 %v1064_v39  ;;  %v1075_v45 = vld [vmem:[#allocation8 + $0x34] ss:$8 sps:$4 sm:$0xff]   ;;  %v1073_v46 = vld [vmem:[#allocation8 + $0x30] ss:$8 sps:$4 sm:$0xff]   ;;  %v1078_v47 = vld [vmem:[#allocation8 + $0x44] ss:$8 sps:$4 sm:$0xff]  }
  0x6a   :  { %398 = vmatpush1.bf16.msra.mxu1 %v1027_v14  ;;  %642 = vmatprep.subr.bf16.mxu0 %v1069_v41  ;;  %v1076_v48 = vld [vmem:[#allocation8 + $0x40] ss:$8 sps:$4 sm:$0xff]   ;;  %v1081_v49 = vld [vmem:[#allocation8 + $0x54] ss:$8 sps:$4 sm:$0xff]   ;;  %v1079_v50 = vld [vmem:[#allocation8 + $0x50] ss:$8 sps:$4 sm:$0xff]  }
  0x6b   :  { %399 = vmatprep.subr.bf16.mxu1 %v1028_v15  ;;  %v1084_v51 = vld [vmem:[#allocation8 + $0x64] ss:$8 sps:$4 sm:$0xff]   ;;  %v1082_v52 = vld [vmem:[#allocation8 + $0x60] ss:$8 sps:$4 sm:$0xff]   ;;  %v1087_v53 = vld [vmem:[#allocation8 + $0x74] ss:$8 sps:$4 sm:$0xff]  }
  0x6c   :  { %v1085_v54 = vld [vmem:[#allocation8 + $0x70] ss:$8 sps:$4 sm:$0xff]   ;;  %v1090_v55 = vld [vmem:[#allocation8 + $0x84] ss:$8 sps:$4 sm:$0xff]   ;;  %v1088_v56 = vld [vmem:[#allocation8 + $0x80] ss:$8 sps:$4 sm:$0xff]  }
  0x6d   :  { %643 = vmatpush1.bf16.msra.mxu0 %v1067_v42  ;;  %v1093_v57 = vld [vmem:[#allocation8 + $0x94] ss:$8 sps:$4 sm:$0xff]   ;;  %v1091_v58 = vld [vmem:[#allocation8 + $0x90] ss:$8 sps:$4 sm:$0xff]   ;;  %v1096_v59 = vld [vmem:[#allocation8 + $0xa4] ss:$8 sps:$4 sm:$0xff]  }
  0x6e   :  { %400 = vmatpush1.bf16.msra.mxu1 %v1030_v16  ;;  %644 = vmatprep.subr.bf16.mxu0 %v1072_v43  ;;  %v1094_v60 = vld [vmem:[#allocation8 + $0xa0] ss:$8 sps:$4 sm:$0xff]   ;;  %v1099_v61 = vld [vmem:[#allocation8 + $0xb4] ss:$8 sps:$4 sm:$0xff]   ;;  %v1097_v62 = vld [vmem:[#allocation8 + $0xb0] ss:$8 sps:$4 sm:$0xff]  }
  0x6f   :  { %401 = vmatprep.subr.bf16.mxu1 %v1031_v17  ;;  %v1102_v63 = vld [vmem:[#allocation8 + $0xc4] ss:$8 sps:$4 sm:$0xff]   ;;  %v1100_v0 = vld [vmem:[#allocation8 + $0xc0] ss:$8 sps:$4 sm:$0xff]   ;;  %v1105_v1 = vld [vmem:[#allocation8 + $0xd4] ss:$8 sps:$4 sm:$0xff]  }
  0x70   :  { %v1103_v2 = vld [vmem:[#allocation8 + $0xd0] ss:$8 sps:$4 sm:$0xff]   ;;  %v109_v4 = vshrl.u32 %v108_v3, 7  ;;  %s879_s13 = sshll.u32 %s1281_s12, 4  ;;  %s880_s13 = int_to_ptr.vmem [resolvable:$true] %s879_s13 }
  0x71   :  { %645 = vmatpush1.bf16.msra.mxu0 %v1070_v44  ;;  %v106_v6 = vld [vmem:[%s1439_s2] sm:$0x3]  ;;  %p1245_p13 = scmp.lt.s32.totalorder %s880_s13, %s880_s13 }
  0x72   :  { %402 = vmatpush1.bf16.msra.mxu1 %v1033_v18  ;;  %646 = vmatprep.subr.bf16.mxu0 %v1075_v45  ;;  %v1402_v5 = vsub.s32 0, %v109_v4  ;;  %v1407_v7 = vsub.s32 1, %v109_v4 }
  0x73   :  { %403 = vmatprep.subr.bf16.mxu1 %v1034_v19 }
  0x74   :  { %v111_v8 = vrot.slane %v106_v6, %v1402_v5  ;;  %v115_v9 = vrot.slane %v106_v6, %v1407_v7 }
  0x75   :  { %647 = vmatpush1.bf16.msra.mxu0 %v1073_v46 }
  0x76   :  { %404 = vmatpush1.bf16.msra.mxu1 %v1036_v20  ;;  %648 = vmatprep.subr.bf16.mxu0 %v1078_v47  ;;  %v1108_v20 = vld [vmem:[#allocation8 + $0xe4] ss:$8 sps:$4 sm:$0xff]  }
  0x77   :  { %405 = vmatprep.subr.bf16.mxu1 %v1037_v21  ;;  %v1106_v21 = vld [vmem:[#allocation8 + $0xe0] ss:$8 sps:$4 sm:$0xff]  }
  0x79   :  { %649 = vmatpush1.bf16.msra.mxu0 %v1076_v48 }
  0x7a   :  { %406 = vmatpush1.bf16.msra.mxu1 %v1039_v22  ;;  %650 = vmatprep.subr.bf16.mxu0 %v1081_v49  ;;  %v1111_v22 = vld [vmem:[#allocation8 + $0xf4] ss:$8 sps:$4 sm:$0xff]  }
  0x7b   :  { %407 = vmatprep.subr.bf16.mxu1 %v1040_v23  ;;  %v1109_v23 = vld [vmem:[#allocation8 + $0xf0] ss:$8 sps:$4 sm:$0xff]  }
  0x7c   :  { %v1124_v49 = vld [vmem:[#allocation10 + $0x70] sm:$0xff]  }
  0x7d   :  { %651 = vmatpush1.bf16.msra.mxu0 %v1079_v50  ;;  %v1125_v50 = vld [vmem:[#allocation10 + $0x30] sm:$0xff]  }
  0x7e   :  { %408 = vmatpush1.bf16.msra.mxu1 %v1042_v24  ;;  %652 = vmatprep.subr.bf16.mxu0 %v1084_v51  ;;  %v1112_v24 = vld [vmem:[#allocation10 + $0x40] sm:$0xff]   ;;  %v1126_v51 = vld [vmem:[#allocation10 + $0x78] sm:$0xff]  }
  0x7f   :  { %409 = vmatprep.subr.bf16.mxu1 %v1043_v25  ;;  %v1113_v25 = vld [vmem:[#allocation10] sm:$0xff]  }
  0x81   :  { %653 = vmatpush1.bf16.msra.mxu0 %v1082_v52  ;;  %v1127_v52 = vld [vmem:[#allocation10 + $0x38] sm:$0xff]  }
  0x82   :  { %410 = vmatpush1.bf16.msra.mxu1 %v1045_v26  ;;  %654 = vmatprep.subr.bf16.mxu0 %v1087_v53  ;;  %v1114_v26 = vld [vmem:[#allocation10 + $0x48] sm:$0xff]   ;;  %v468_v53 = vld [vmem:[%s1443_s6] sm:$0x3] }
  0x83   :  { %411 = vmatprep.subr.bf16.mxu1 %v1046_v27  ;;  %v1115_v27 = vld [vmem:[#allocation10 + $0x8] sm:$0xff]  }
  0x85   :  { %655 = vmatpush1.bf16.msra.mxu0 %v1085_v54  ;;  %v473_v54 = vrot.slane %v468_v53, %v1402_v5 }
  0x86   :  { %412 = vmatpush1.bf16.msra.mxu1 %v1048_v28  ;;  %656 = vmatprep.subr.bf16.mxu0 %v1090_v55  ;;  %v1116_v28 = vld [vmem:[#allocation10 + $0x50] sm:$0xff]   ;;  %v477_v55 = vrot.slane %v468_v53, %v1407_v7 }
  0x87   :  { %413 = vmatprep.subr.bf16.mxu1 %v1049_v29  ;;  %v1117_v29 = vld [vmem:[#allocation10 + $0x10] sm:$0xff]  }
  0x89   :  { %657 = vmatpush1.bf16.msra.mxu0 %v1088_v56 }
  0x8a   :  { %414 = vmatpush1.bf16.msra.mxu1 %v1051_v30  ;;  %658 = vmatprep.subr.bf16.mxu0 %v1093_v57  ;;  %v1118_v30 = vld [vmem:[#allocation10 + $0x58] sm:$0xff]  }
  0x8b   :  { %415 = vmatprep.subr.bf16.mxu1 %v1052_v31  ;;  %v1119_v31 = vld [vmem:[#allocation10 + $0x18] sm:$0xff]  }
  0x8d   :  { %659 = vmatpush1.bf16.msra.mxu0 %v1091_v58 }
  0x8e   :  { %416 = vmatpush1.bf16.msra.mxu1 %v1054_v32  ;;  %660 = vmatprep.subr.bf16.mxu0 %v1096_v59  ;;  %v1120_v32 = vld [vmem:[#allocation10 + $0x60] sm:$0xff]  }
  0x8f   :  { %417 = vmatprep.subr.bf16.mxu1 %v1055_v33  ;;  %v1121_v33 = vld [vmem:[#allocation10 + $0x20] sm:$0xff]  }
  0x91   :  { %661 = vmatpush1.bf16.msra.mxu0 %v1094_v60 }
  0x92   :  { %418 = vmatpush1.bf16.msra.mxu1 %v1057_v34  ;;  %662 = vmatprep.subr.bf16.mxu0 %v1099_v61  ;;  %v1122_v34 = vld [vmem:[#allocation10 + $0x68] sm:$0xff]  }
  0x93   :  { %419 = vmatprep.subr.bf16.mxu1 %v1058_v35  ;;  %v1123_v35 = vld [vmem:[#allocation10 + $0x28] sm:$0xff]  }
  0x95   :  { %663 = vmatpush1.bf16.msra.mxu0 %v1097_v62 }
  0x96   :  { %420 = vmatpush1.bf16.msra.mxu1 %v1060_v36  ;;  %664 = vmatprep.subr.bf16.mxu0 %v1102_v63  ;;  %v219_v36 = vld [vmem:[%s1441_s4] sm:$0x3] }
  0x97   :  { %421 = vmatprep.subr.bf16.mxu1 %v1061_v37  ;;  %v224_v37 = vrot.slane %v219_v36, %v1402_v5  ;;  %v959_v5 = vld [vmem:[%s1445_s8] ss:$0 sm:$0xff]  ;;  %s1240_s8 = scalar_lea.vmem %s880_s13, 128 }
  0x98   :  { %p1241_p12 = scmp.ne.s32.totalorder %s880_s13, %s1240_s8  ;;  %p1246_p0 = scmp.lt.s32.totalorder %s1240_s8, %s1240_s8 }
  0x99   :  { %665 = vmatpush1.bf16.msra.mxu0 %v1100_v0 }
  0x9a   :  { %422 = vmatpush1.bf16.msra.mxu1 %v1063_v38  ;;  %666 = vmatprep.subr.bf16.mxu0 %v1105_v1  ;;  %v228_v38 = vrot.slane %v219_v36, %v1407_v7  ;;  %p1247_p1 = por %p1246_p0, %p1245_p13 }
  0x9b   :  { %976 = vmatprep.subr.bf16.mxu1 %v1112_v24 }
  0x9c   :  { %p1248_p2 = pnand %p1247_p1, %p1241_p12 }
  0x9d   :  { %667 = vmatpush1.bf16.msra.mxu0 %v1103_v2  ;;  %v862_v2 = vand.u32 127, %v108_v3 }
  0x9e   :  { %668 = vmatprep.subr.bf16.mxu0 %v1108_v20 }
  0x9f   :  { %vm863_vm1 = vcmp.eq.s32.totalorder %v862_v2, 3  ;;  %vm865_vm2 = vcmp.eq.s32.totalorder %v862_v2, 4  ;;  %vm867_vm3 = vcmp.eq.s32.totalorder %v862_v2, 5  ;;  %vm869_vm4 = vcmp.eq.s32.totalorder %v862_v2, 6 }
  0xa1   :  { %669 = vmatpush1.bf16.msra.mxu0 %v1106_v21 }
  0xa2   :  { %670 = vmatprep.subr.bf16.mxu0 %v1111_v22 }
  0xa5   :  { %671 = vmatpush1.bf16.msra.mxu0 %v1109_v23 }
 0x136   :  { %v176_v10 = vpop.f32.mrb[0].mxu0 }
 0x137   :  { %v177_v11 = vadd.f32 %v176_v10, %v111_v8  ;;  %v178_v12 = vpop.f32.mrb[1].mxu0 }
 0x138   :  { %v179_v13 = vadd.f32 %v178_v12, %v115_v9  ;;  %v180_v14 = vpop.f32.mrb[2].mxu0 }
 0x139   :  { %v183_v15 = vmax.f32 %v177_v11, 0.0  ;;  %v181_v16 = vpop.f32.mrb[3].mxu0  ;;  %v1280_v11 = vmov 1.0  }
 0x13a   :  { %v184_v17 = vmax.f32 %v179_v13, 0.0  ;;  %v864_v12 = vsel %vm863_vm1, 0.1, %v1280_v11 }
 0x13b   :  { %v185_v19 = vpack.c.bf16 %v183_v15, %v183_v15  ;;  %v866_v13 = vsel %vm865_vm2, 0.1, %v864_v12 }
 0x13c   :  { %v186_v18 = vpack.c.bf16 %v184_v17, %v184_v17  ;;  %v868_v14 = vsel %vm867_vm3, 0.1, %v866_v13 }
 0x13d   :  { %v870_v3 = vsel %vm869_vm4, 0.1, %v868_v14 }
 0x13e   :  { %423 = vmatprep.mubr.bf16.mxu1 %v186_v18 }
 0x13f   :  { %424 = vmatmul.mubr.bf16.vlgmr.msra.gmra.mrb[0].mxu1 %v185_v19 }
 0x140   :  { %977 = vmatpush3.bf16.msra.mxu1 %v1113_v25 }
 0x141   :  { %978 = vmatprep.subr.bf16.mxu1 %v1114_v26 }
 0x144   :  { %979 = vmatpush3.bf16.msra.mxu1 %v1115_v27 }
 0x145   :  { %980 = vmatprep.subr.bf16.mxu1 %v1116_v28 }
 0x148   :  { %981 = vmatpush3.bf16.msra.mxu1 %v1117_v29 }
 0x149   :  { %982 = vmatprep.subr.bf16.mxu1 %v1118_v30 }
 0x14c   :  { %983 = vmatpush3.bf16.msra.mxu1 %v1119_v31 }
 0x14d   :  { %984 = vmatprep.subr.bf16.mxu1 %v1120_v32 }
 0x150   :  { %985 = vmatpush3.bf16.msra.mxu1 %v1121_v33 }
 0x151   :  { %986 = vmatprep.subr.bf16.mxu1 %v1122_v34 }
 0x154   :  { %987 = vmatpush3.bf16.msra.mxu1 %v1123_v35 }
 0x155   :  { %988 = vmatprep.subr.bf16.mxu1 %v1124_v49 }
 0x158   :  { %989 = vmatpush3.bf16.msra.mxu1 %v1125_v50 }
 0x159   :  { %990 = vmatprep.subr.bf16.mxu1 %v1126_v51 }
 0x15c   :  { %991 = vmatpush3.bf16.msra.mxu1 %v1127_v52 }
 0x212   :  { %v425_v39 = vpop.f32.mrb[0].mxu1 }
 0x213   :  { %v426_v40 = vadd.f32 %v425_v39, %v224_v37  ;;  %v427_v41 = vpop.f32.mrb[1].mxu1 }
 0x214   :  { %v428_v42 = vadd.f32 %v427_v41, %v228_v38  ;;  %v429_v43 = vpop.f32.mrb[2].mxu1 }
 0x215   :  { %v432_v44 = vmax.f32 %v426_v40, 0.0  ;;  %v430_v45 = vpop.f32.mrb[3].mxu1 }
 0x216   :  { %v433_v46 = vmax.f32 %v428_v42, 0.0 }
 0x217   :  { %v434_v48 = vpack.c.bf16 %v432_v44, %v432_v44 }
 0x218   :  { %v435_v47 = vpack.c.bf16 %v433_v46, %v433_v46 }
 0x21a   :  { %672 = vmatprep.mubr.bf16.mxu0 %v435_v47 }
 0x21b   :  { %673 = vmatmul.mubr.bf16.vlgmr.msra.gmra.mrb[4].mxu0 %v434_v48 }
 0x2ee   :  { %v674_v56 = vpop.f32.mrb[4].mxu0 }
 0x2ef   :  { %v675_v57 = vadd.f32 %v674_v56, %v473_v54  ;;  %v676_v58 = vpop.f32.mrb[5].mxu0 }
 0x2f0   :  { %v677_v59 = vadd.f32 %v676_v58, %v477_v55  ;;  %v678_v60 = vpop.f32.mrb[6].mxu0 }
 0x2f1   :  { %v681_v61 = vmax.f32 %v675_v57, 0.0  ;;  %v679_v62 = vpop.f32.mrb[7].mxu0 }
 0x2f2   :  { %v682_v63 = vmax.f32 %v677_v59, 0.0 }
 0x2f3   :  { %v683_v1 = vpack.c.bf16 %v681_v61, %v681_v61 }
 0x2f4   :  { %v684_v0 = vpack.c.bf16 %v682_v63, %v682_v63 }
 0x2f6   :  { %852 = vmatprep.mubr.bf16.mxu1 %v684_v0 }
 0x2f7   :  { %853 = vmatmul.mubr.bf16.vlgmr.msra.gmra.mrb[4].mxu1 %v683_v1 }
 0x3ca   :  { %v992_v4 = vpop.f32.mrb[4].mxu1 }
 0x3cb   :  { %v993_v6 = vpop.f32.mrb[5].mxu1 }
 0x3cc   :  { %v994_v7 = vadd.f32 %v993_v6, %v992_v4  ;;  %v995_v8 = vpop.f32.mrb[6].mxu1 }
 0x3cd   :  { %v996_v9 = vpop.f32.mrb[7].mxu1 }
 0x3ce   :  { %v855_v10 = vadd.f32 %v994_v7, %v959_v5 }
 0x3d0   :  { %1128 = vtanh.f32 %v855_v10 }
 0x3da   :  { %v1129_v15 = vpop.eup %1128 }
 0x3db   :  { %v871_v16 = vmul.f32 %v1129_v15, %v870_v3 }
 0x3dd   :  { %872 = vst [vmem:[#allocation11] sm:$0xff] %v871_v16 }
 0x3de   :  { %1251 = shalt.err (!%p1248_p2)
}
 0x3df   :  { %s1252_s14 = scalar_lea.hbm %s1446_s9, 128 }
 0x3e0   :  { %p1253_p3 = scmp.ne.s32.totalorder %s1446_s9, %s1252_s14  ;;  %p1256_p4 = scmp.lt.u32.totalorder %s1252_s14, %s1446_s9 }
 0x3e2   :  { %p1258_p5 = pnand %p1256_p4, %p1253_p3 }
 0x3e4   :  { %1261 = shalt.err (!%p1258_p5)
}
 0x3e5   :  { %882 = dma.vmem_to_hbm [thread:$0]  %s880_s13, 128, %s1446_s9, [#allocation4]  }
 0x3e6   :  { %1268 = dma.done.wait [#allocation4], 128  }
 0x3e7   :  { %1269 = vsyncadd [#allocation4], 4294967168 }
 0x3e8   :  { %886 = vsyncpa [#allocation3], 1 }
 0x3e9   :  { %887 = vsyncpa [#allocation6], 1 }
 0x3ea   :  { %888 = vsyncpa [#allocation9], 1 }
 0x3eb   :  { %889 = vsyncpa [#allocation4], 1 }

</bundles_post_ra>
